<compile_context>
chip_gen: v7x
topology: tpu7x:2x2x1
jax: 0.10.0
libtpu: 0.0.40
codegen_flags: <defaults>
</compile_context>

<pallas_src>
import jax
import jax.numpy as jnp
from jax.experimental import pallas as pl
from jax.experimental.pallas import tpu as pltpu


_LANE = 128
_ROW_GRAN = 16                          # bf16 sublane packing: 16-aligned row tiles
_VMEM_SAFE_BYTES = 48 * 1024 * 1024     # stay well under v7x's 64 MiB physical VMEM
_VMEM_LIMIT_CAP = 56 * 1024 * 1024


def _round_up(a: int, b: int) -> int:
    return (a + b - 1) // b * b


def _choose_tile(dim: int, target: int, gran: int = _LANE) -> int:
    """Lane-dense tile: full dim when tiny, else a `gran`-multiple <= target.
    (Default targets are 256-multiples, matching the 256-wide MXU on v6e/v7x.)"""
    if dim <= _LANE:
        return dim
    return max((min(target, _round_up(dim, gran)) // gran) * gran, gran)


def _halve(t: int, gran: int) -> int:
    return max((t // 2 // gran) * gran, gran)


def _merge_linear_kernel(x_ref, w_ref, g_ref, b_ref, o_ref, acc_ref):
    # x_ref:   VMEM (TM, TK)       row tile of flattened x (reused across the K loop)
    # w_ref:   VMEM (1, TK, TN)    expert-k weight tile, (H_in, H_out) layout
    # g_ref:   VMEM (TM, K) f32    per-row gating probs (row -> its sample's prob row)
    # b_ref:   VMEM (K, TN) f32    all expert biases for this H_out tile
    # o_ref:   VMEM (TM, TN)       output tile (written once, at the last step)
    # acc_ref: VMEM (TM, TN) f32   accumulator, persists across (ik, k)
    ik = pl.program_id(2)        # H_in tile index   (reduction)
    k = pl.program_id(3)         # expert index      (reduction, innermost)
    n_ik = pl.num_programs(2)
    n_k = pl.num_programs(3)

    @pl.when((ik == 0) & (k == 0))
    def _init():
        acc_ref[...] = jnp.zeros_like(acc_ref)

    # Select column k of the (TM, K) gate tile -> per-row gate (TM, 1), f32 (VPU work,
    # hidden under the MXU).
    lane = jax.lax.broadcasted_iota(jnp.int32, g_ref.shape, 1)
    gate_col = jnp.sum(jnp.where(lane == k, g_ref[...], 0.0), axis=1, keepdims=True)

    # (TM, TK) @ (TK, TN) -> (TM, TN) on the MXU, f32 accumulation.
    part = jnp.dot(x_ref[...], w_ref[0], preferred_element_type=jnp.float32)
    acc_ref[...] += gate_col * part

    @pl.when((ik == n_ik - 1) & (k == n_k - 1))
    def _finalize():
        # Mixed bias for every row: (TM, K) @ (K, TN) - tiny matmul, done once.
        bias_tile = jnp.dot(g_ref[...], b_ref[...], preferred_element_type=jnp.float32)
        o_ref[...] = (acc_ref[...] + bias_tile).astype(o_ref.dtype)


def prepare_expert_weights(weights, compute_dtype=jnp.bfloat16):
    """One-time prep, hoist/cache this outside the per-call path:
    (K, H_out, H_in) -> (K, H_in, H_out), cast to the MXU operand dtype.
    Pass the result to merge_linear(..., weights_pre_transposed=True)."""
    w_t = jnp.transpose(weights, (0, 2, 1))
    if compute_dtype is not None:
        w_t = w_t.astype(compute_dtype)
    return w_t


def merge_linear(
    x,
    prob,
    weights,
    biases=None,
    *,
    block_rows: int = 1024,
    block_out: int = 1024,
    block_in: int = 1024,
    compute_dtype=jnp.bfloat16,      # bf16 operands by default (f32 accumulation)
    weights_pre_transposed: bool = False,
    weight_buffers: int = 2,         # >2 -> pl.Buffered(n) on the weight stream
):
    """x: (N, S, H_in), prob: (N, K),
    weights: (K, H_out, H_in)  [or (K, H_in, H_out) if weights_pre_transposed],
    biases: (K, H_out) | None."""
    N, S, Hin = x.shape
    if weights_pre_transposed:
        K, Hin_w, Hout = weights.shape
    else:
        K, Hout, Hin_w = weights.shape
    assert Hin_w == Hin, "weight in_features mismatch"
    assert prob.shape == (N, K)
    out_dtype = x.dtype
    if compute_dtype is None:
        compute_dtype = x.dtype

    if biases is None:
        biases = jnp.zeros((K, Hout), dtype=jnp.float32)

    # ---- layout prep (transpose is hoistable via prepare_expert_weights) ----------
    w_t = weights if weights_pre_transposed else jnp.transpose(weights, (0, 2, 1))
    w_t = w_t.astype(compute_dtype)                              # (K, Hin, Hout)
    x2 = x.reshape(N * S, Hin).astype(compute_dtype)             # (R, Hin)
    gate = jnp.repeat(prob.astype(jnp.float32), S, axis=0)       # (R, K)
    b2 = biases.astype(jnp.float32)                              # (K, Hout)

    # ---- tiling --------------------------------------------------------------------
    R = N * S
    TK = _choose_tile(Hin, block_in)
    TN = _choose_tile(Hout, block_out)
    TM = max(_round_up(min(block_rows, _round_up(R, _ROW_GRAN)), _ROW_GRAN), _ROW_GRAN)
    # Avoid large padded-row waste for awkward R while keeping MXU-sized row tiles.
    while TM > 2 * _ROW_GRAN and (_round_up(R, TM) - R) * 4 > R:
        TM = _halve(TM, _ROW_GRAN)

    in_item = jnp.dtype(compute_dtype).itemsize
    out_item = jnp.dtype(out_dtype).itemsize
    wbuf = max(int(weight_buffers), 2)

    def vmem_est(tm, tk, tn):
        return (2 * tm * tk * in_item + wbuf * tk * tn * in_item
                + 2 * tm * K * 4 + 2 * K * tn * 4
                + 2 * tm * tn * out_item + tm * tn * 4)

    # Keep the working set comfortably inside v7x's 64 MiB physical VMEM.
    while vmem_est(TM, TK, TN) > _VMEM_SAFE_BYTES:
        if TN >= TK and TN > _LANE:
            TN = _halve(TN, _LANE)
        elif TK > _LANE:
            TK = _halve(TK, _LANE)
        elif TM > _ROW_GRAN:
            TM = _halve(TM, _ROW_GRAN)
        else:
            break

    R_pad = _round_up(R, TM)
    Hin_p = _round_up(Hin, TK)
    Hout_p = _round_up(Hout, TN)

    # Zero-pad to tile multiples: padded rows get a zero gate, padded H_in columns
    # multiply zero weight rows, padded H_out columns are sliced off -> exact result.
    if R_pad != R or Hin_p != Hin:
        x2 = jnp.pad(x2, ((0, R_pad - R), (0, Hin_p - Hin)))
    if R_pad != R:
        gate = jnp.pad(gate, ((0, R_pad - R), (0, 0)))
    if Hin_p != Hin or Hout_p != Hout:
        w_t = jnp.pad(w_t, ((0, 0), (0, Hin_p - Hin), (0, Hout_p - Hout)))
    if Hout_p != Hout:
        b2 = jnp.pad(b2, ((0, 0), (0, Hout_p - Hout)))

    # Expert axis K innermost: x block index (i, ik) is constant across the K loop,
    # so the x tile is NOT re-DMA'd per expert.
    grid = (R_pad // TM, Hout_p // TN, Hin_p // TK, K)

    w_index = lambda i, j, ik, k: (k, ik, j)
    if int(weight_buffers) > 2:
        try:
            w_spec = pl.BlockSpec((1, TK, TN), w_index,
                                  pipeline_mode=pl.Buffered(int(weight_buffers)))
        except TypeError:  # BlockSpec without pipeline_mode support
            w_spec = pl.BlockSpec((1, TK, TN), w_index)
    else:
        w_spec = pl.BlockSpec((1, TK, TN), w_index)

    est = vmem_est(TM, TK, TN)
    vmem_limit = int(min(max(32 * 1024 * 1024, 2 * est), _VMEM_LIMIT_CAP))

    cost = pl.CostEstimate(
        flops=2 * R * Hin * Hout * K + 2 * R * K * Hout,
        transcendentals=0,
        bytes_accessed=int(
            (Hout_p // TN) * R_pad * Hin_p * in_item            # x (re-read per H_out tile)
            + (R_pad // TM) * K * Hin_p * Hout_p * in_item      # expert weight stream
            + R_pad * K * 4 + K * Hout_p * 4                    # gate + biases
            + R_pad * Hout_p * out_item),                       # output
    )

    out = pl.pallas_call(
        _merge_linear_kernel,
        out_shape=jax.ShapeDtypeStruct((R_pad, Hout_p), out_dtype),
        grid_spec=pltpu.PrefetchScalarGridSpec(
            num_scalar_prefetch=0,
            grid=grid,
            in_specs=[
                pl.BlockSpec((TM, TK), lambda i, j, ik, k: (i, ik)),   # x rows (reused over k)
                w_spec,                                                # expert weight tile
                pl.BlockSpec((TM, K), lambda i, j, ik, k: (i, 0)),     # per-row gate
                pl.BlockSpec((K, TN), lambda i, j, ik, k: (0, j)),     # expert biases
            ],
            out_specs=pl.BlockSpec((TM, TN), lambda i, j, ik, k: (i, j)),
            scratch_shapes=[pltpu.VMEM((TM, TN), jnp.float32)],
        ),
        compiler_params=pltpu.CompilerParams(
            dimension_semantics=("parallel", "parallel", "arbitrary", "arbitrary"),
            vmem_limit_bytes=vmem_limit,
        ),
        cost_estimate=cost,
    )(x2, w_t, gate, b2)

    return out[:R, :Hout].reshape(N, S, Hout)


def reference(x, prob, weights, biases):
    # Pure-JAX reference mirroring the PyTorch forward (mix weights/bias first).
    xf = x.astype(jnp.float32)
    wf = weights.astype(jnp.float32)
    bf = biases.astype(jnp.float32)
    pf = prob.astype(jnp.float32)
    w_mix = jnp.sum(wf[None] * pf[:, :, None, None], axis=1)        # (N, Hout, Hin)
    b_mix = jnp.sum(bf[None] * pf[:, :, None], axis=1)              # (N, Hout)
    y = jnp.einsum("nsi,noi->nso", xf, w_mix) + b_mix[:, None, :]
    return y.astype(x.dtype)


def _make_inputs(key, N, S, Hin, Hout, K):
    kx, kp, kw, kb = jax.random.split(key, 4)
    x = jax.random.normal(kx, (N, S, Hin), dtype=jnp.float32)
    prob = jax.nn.softmax(jax.random.normal(kp, (N, K), dtype=jnp.float32), axis=-1)
    weights = jax.random.normal(kw, (K, Hout, Hin), dtype=jnp.float32) * 0.05
    biases = jax.random.normal(kb, (K, Hout), dtype=jnp.float32) * 0.05
    return x, prob, weights, biases


if __name__ == "__main__":
    # Small config consistent with the module (batch=2, seq=8, hidden=32, 4 experts);
    # full f32 operand path for a tight-tolerance check.
    x, prob, w, b = _make_inputs(jax.random.PRNGKey(0), N=2, S=8, Hin=32, Hout=32, K=4)
    y = jax.block_until_ready(merge_linear(x, prob, w, b, compute_dtype=jnp.float32))
    y_ref = reference(x, prob, w, b)
    assert y.shape == y_ref.shape
    assert jnp.allclose(y, y_ref, rtol=1e-4, atol=1e-4), "mismatch vs reference (f32 small)"

    # Config exercising row / H_out / H_in tiling, dimension padding (H_in=320, H_out=384
    # are not tile multiples) and both reduction grid axes (expert axis innermost).
    x2, p2, w2, b2 = _make_inputs(jax.random.PRNGKey(1), N=4, S=48, Hin=320, Hout=384, K=4)
    y2 = jax.block_until_ready(
        merge_linear(x2, p2, w2, b2,
                     block_rows=128, block_out=256, block_in=256,
                     compute_dtype=jnp.float32)
    )
    y2_ref = reference(x2, p2, w2, b2)
    assert jnp.allclose(y2, y2_ref, rtol=1e-4, atol=1e-4), "mismatch vs reference (f32 tiled)"

    # Default bf16 operand path (f32 MXU accumulation) with hoisted pre-transposed weights.
    w2_t = prepare_expert_weights(w2, compute_dtype=jnp.bfloat16)
    y3 = jax.block_until_ready(
        merge_linear(x2, p2, w2_t, b2,
                     block_rows=128, block_out=256, block_in=256,
                     weights_pre_transposed=True)
    )
    assert jnp.allclose(y3, y2_ref, rtol=5e-2, atol=5e-2), "mismatch vs reference (bf16)"

    print("KERNEL_OK")
</pallas_src>

<mosaic_0001>
module attributes {stable_mosaic.version = 11 : i64} {
  func.func @_merge_linear_kernel(%arg0: i32, %arg1: i32, %arg2: i32, %arg3: i32, %arg4: memref<16x32xf32, #tpu.memory_space<vmem>>, %arg5: memref<1x32x32xf32, #tpu.memory_space<vmem>>, %arg6: memref<16x4xf32, #tpu.memory_space<vmem>>, %arg7: memref<4x32xf32, #tpu.memory_space<vmem>>, %arg8: memref<16x32xf32, #tpu.memory_space<vmem>>, %arg9: memref<16x32xf32, #tpu.memory_space<vmem>>) attributes {dimension_semantics = [#tpu.dimension_semantics<parallel>, #tpu.dimension_semantics<parallel>, #tpu.dimension_semantics<arbitrary>, #tpu.dimension_semantics<arbitrary>], iteration_bounds = array<i64: 1, 1, 1, 4>, scalar_prefetch = 0 : i64, scratch_operands = 1 : i64, tpu.core_type = #tpu.core_type<tc>, window_params = [{transform_indices = @transform_0, window_bounds = array<i64: 16, 32>}, {transform_indices = @transform_1, window_bounds = array<i64: 1, 32, 32>}, {transform_indices = @transform_2, window_bounds = array<i64: 16, 4>}, {transform_indices = @transform_3, window_bounds = array<i64: 4, 32>}, {transform_indices = @transform_4, window_bounds = array<i64: 16, 32>}]} {
    %c0_i32 = arith.constant 0 : i32
    %0 = arith.cmpi eq, %arg2, %c0_i32 : i32
    %c0_i32_0 = arith.constant 0 : i32
    %1 = arith.cmpi eq, %arg3, %c0_i32_0 : i32
    %2 = arith.andi %0, %1 : i1
    %3 = arith.extui %2 : i1 to i32
    %c0_i32_1 = arith.constant 0 : i32
    %4 = arith.cmpi ne, %3, %c0_i32_1 : i32
    scf.if %4 {
      %cst_16 = arith.constant 0.000000e+00 : f32
      %27 = vector.broadcast %cst_16 : f32 to vector<16x32xf32>
      %c0_17 = arith.constant 0 : index
      %c0_18 = arith.constant 0 : index
      %28 = vector.load %arg9[%c0_17, %c0_18] : memref<16x32xf32, #tpu.memory_space<vmem>>, vector<16x32xf32>
      tpu.vector_store %arg9[%c0_17, %c0_18], %27 {strides = array<i32>} : memref<16x32xf32, #tpu.memory_space<vmem>>, vector<16x32xf32>,
    } else {
    }
    %5 = tpu.iota {dimensions = array<i32: 1>} : vector<16x4xi32>
    %6 = vector.broadcast %arg3 : i32 to vector<16x4xi32>
    %7 = arith.cmpi eq, %5, %6 : vector<16x4xi32>
    %c0 = arith.constant 0 : index
    %c0_2 = arith.constant 0 : index
    %8 = vector.load %arg6[%c0, %c0_2] : memref<16x4xf32, #tpu.memory_space<vmem>>, vector<16x4xf32>
    %cst = arith.constant 0.000000e+00 : f32
    %9 = vector.broadcast %cst : f32 to vector<16x4xf32>
    %10 = arith.select %7, %8, %9 : vector<16x4xi1>, vector<16x4xf32>
    %cst_3 = arith.constant dense<0.000000e+00> : vector<16xf32>
    %11 = vector.multi_reduction <add>, %10, %cst_3 [1] : vector<16x4xf32> to vector<16xf32>
    %12 = vector.shape_cast %11 : vector<16xf32> to vector<16x1xf32>
    %c0_4 = arith.constant 0 : index
    %c0_5 = arith.constant 0 : index
    %13 = vector.load %arg4[%c0_4, %c0_5] : memref<16x32xf32, #tpu.memory_space<vmem>>, vector<16x32xf32>
    %c0_6 = arith.constant 0 : index
    %c0_7 = arith.constant 0 : index
    %c0_8 = arith.constant 0 : index
    %14 = vector.load %arg5[%c0_6, %c0_7, %c0_8] : memref<1x32x32xf32, #tpu.memory_space<vmem>>, vector<1x32x32xf32>
    %15 = vector.shape_cast %14 : vector<1x32x32xf32> to vector<32x32xf32>
    %cst_9 = arith.constant dense<0.000000e+00> : vector<16x32xf32>
    %16 = tpu.matmul %13, %15, %cst_9 {dimension_numbers = #tpu.dot_dimension_numbers<[1], [0], [0], [1], [0, 0, 1, 1], [], []>} : vector<16x32xf32>, vector<32x32xf32>, vector<16x32xf32> -> vector<16x32xf32>
    %c0_10 = arith.constant 0 : index
    %c0_11 = arith.constant 0 : index
    %17 = vector.load %arg9[%c0_10, %c0_11] : memref<16x32xf32, #tpu.memory_space<vmem>>, vector<16x32xf32>
    %18 = vector.broadcast %12 : vector<16x1xf32> to vector<16x32xf32>
    %19 = arith.mulf %18, %16 : vector<16x32xf32>
    %20 = arith.addf %17, %19 : vector<16x32xf32>
    %c0_12 = arith.constant 0 : index
    %c0_13 = arith.constant 0 : index
    %21 = vector.load %arg9[%c0_12, %c0_13] : memref<16x32xf32, #tpu.memory_space<vmem>>, vector<16x32xf32>
    tpu.vector_store %arg9[%c0_12, %c0_13], %20 {strides = array<i32>} : memref<16x32xf32, #tpu.memory_space<vmem>>, vector<16x32xf32>,
    %c0_i32_14 = arith.constant 0 : i32
    %22 = arith.cmpi eq, %arg2, %c0_i32_14 : i32
    %c3_i32 = arith.constant 3 : i32
    %23 = arith.cmpi eq, %arg3, %c3_i32 : i32
    %24 = arith.andi %22, %23 : i1
    %25 = arith.extui %24 : i1 to i32
    %c0_i32_15 = arith.constant 0 : i32
    %26 = arith.cmpi ne, %25, %c0_i32_15 : i32
    scf.if %26 {
      %c0_16 = arith.constant 0 : index
      %c0_17 = arith.constant 0 : index
      %27 = vector.load %arg6[%c0_16, %c0_17] : memref<16x4xf32, #tpu.memory_space<vmem>>, vector<16x4xf32>
      %c0_18 = arith.constant 0 : index
      %c0_19 = arith.constant 0 : index
      %28 = vector.load %arg7[%c0_18, %c0_19] : memref<4x32xf32, #tpu.memory_space<vmem>>, vector<4x32xf32>
      %cst_20 = arith.constant dense<0.000000e+00> : vector<16x32xf32>
      %29 = tpu.matmul %27, %28, %cst_20 {dimension_numbers = #tpu.dot_dimension_numbers<[1], [0], [0], [1], [0, 0, 1, 1], [], []>} : vector<16x4xf32>, vector<4x32xf32>, vector<16x32xf32> -> vector<16x32xf32>
      %c0_21 = arith.constant 0 : index
      %c0_22 = arith.constant 0 : index
      %30 = vector.load %arg9[%c0_21, %c0_22] : memref<16x32xf32, #tpu.memory_space<vmem>>, vector<16x32xf32>
      %31 = arith.addf %30, %29 : vector<16x32xf32>
      %c0_23 = arith.constant 0 : index
      %c0_24 = arith.constant 0 : index
      %32 = vector.load %arg8[%c0_23, %c0_24] : memref<16x32xf32, #tpu.memory_space<vmem>>, vector<16x32xf32>
      tpu.vector_store %arg8[%c0_23, %c0_24], %31 {strides = array<i32>} : memref<16x32xf32, #tpu.memory_space<vmem>>, vector<16x32xf32>,
    } else {
    }
    return
  }
  func.func @transform_0(%arg0: i32, %arg1: i32, %arg2: i32, %arg3: i32) -> (i32, i32) {
    %c0_i32 = arith.constant 0 : i32
    return %arg0, %arg2 : i32, i32
  }
  func.func @transform_1(%arg0: i32, %arg1: i32, %arg2: i32, %arg3: i32) -> (i32, i32, i32) {
    %c0_i32 = arith.constant 0 : i32
    return %arg3, %arg2, %arg1 : i32, i32, i32
  }
  func.func @transform_2(%arg0: i32, %arg1: i32, %arg2: i32, %arg3: i32) -> (i32, i32) {
    %c0_i32 = arith.constant 0 : i32
    %c0_i32_0 = arith.constant 0 : i32
    return %arg0, %c0_i32 : i32, i32
  }
  func.func @transform_3(%arg0: i32, %arg1: i32, %arg2: i32, %arg3: i32) -> (i32, i32) {
    %c0_i32 = arith.constant 0 : i32
    %c0_i32_0 = arith.constant 0 : i32
    return %c0_i32, %arg1 : i32, i32
  }
  func.func @transform_4(%arg0: i32, %arg1: i32, %arg2: i32, %arg3: i32) -> (i32, i32) {
    %c0_i32 = arith.constant 0 : i32
    return %arg0, %arg1 : i32, i32
  }
}

</mosaic_0001>

<bundles_post_ra>
// kernel: tpu_custom_call.1
= control target key start
LH: loop header
LB: loop body
LE: loop exit
PB: predicated region body
PF: predicated region fallthrough
CT: control target
= control target key end

     0   :  { %9 = vsyncpa [#allocation4], 0  ;;  %s1123_s0 = inlined_call_operand.vmem [shape: f32[16,32], index: 0, kind: input, shape index: {}]   ;;  %s1124_s1 = inlined_call_operand.hbm [shape: f32[4,32,32], index: 1, kind: input, shape index: {}]   ;;  %s1125_s2 = inlined_call_operand.vmem [shape: f32[16,4], index: 2, kind: input, shape index: {}]   ;;  %s1126_s3 = inlined_call_operand.vmem [shape: f32[4,32], index: 3, kind: input, shape index: {}]   ;;  %s1127_s4 = inlined_call_operand.hbm [shape: f32[16,32], index: 4, kind: output, shape index: {}]  }
   0x1   :  { %11 = vsyncpa [#allocation4 + $0x1], 0 }
   0x2   :  { %12 = vsyncpa [#allocation5], 0  ;;  %s940_s15 = smov 0   ;;  %s942_s16 = smov 0  }
   0x3   :  { %s944_s17 = smov 0   ;;  %s946_s18 = smov 0  }
   0x4   :  { %s948_s19 = smov 0   ;;  %s950_s20 = smov 0  }
   0x5 LB: > { %s671_s21 = sadd.s32 4294967295, %s906_s20   ;;  %s33_s22 = sadd.s32 1, %s902_s19  ;;  %s906_s20 = sphi %s950_s20, %s18_s20   ;;  %s902_s19 = sphi %s948_s19, %s1136_s19   ;;  %s898_s18 = sphi %s946_s18, %s1135_s18   ;;  %s894_s17 = sphi %s944_s17, %s1134_s17   ;;  %s890_s16 = sphi %s942_s16, %s1133_s16   ;;  %s886_s15 = sphi %s940_s15, %s1132_s15  }
   0x6   : > { %p34_p0 = scmp.ge.s32.totalorder %s33_s22, 4  ;;  %s83_s23 = sadd.s32 1, %s894_s17 }
   0x7   : > { %p90_p1 = scmp.ne.s32.totalorder %s894_s17, %s890_s16  ;;  %p91_p2 = scmp.eq.s32.totalorder %s906_s20, 0 }
   0x8   : > { %s1138_s22 = smov (%p34_p0, %s33_s22), 0  ;;  %p96_p4 = scmp.ne.s32.totalorder %s890_s16, %s886_s15 }
   0x9   : > { %p976_p3 = por %p91_p2, %p90_p1  ;;  %s76_s25 = ssub.s32 %s902_s19, %s1138_s22 }
   0xa   : > { %p97_p5 = scmp.eq.s32.totalorder %s671_s21, 0  ;;  %p81_p6 = scmp.eq.s32.totalorder %s76_s25, 0 }
   0xb   : > { %p739_p8 = scmp.lt.s32.totalorder %s906_s20, 4  ;;  %s228_s28 = sand.u32 1, %s894_s17  }
   0xc   : > { %p985_p7 = por %p97_p5, %p96_p4  ;;  %s693_s29 = sshll.u32 %s902_s19, 9 }
   0xd   : > { %s991_s27 = scalar_select %p81_p6, %s894_s17, %s83_s23  }
   0xe   : > { %s677_s30 = sshll.u32 %s228_s28, 5  ;;  %s998_s7 = scalar_lea.hbm %s1124_s1, %s693_s29 }
   0xf   : > { %s232_s8 = scalar_lea.vmem [#allocation3], %s677_s30  ;;  %p1002_p9 = pnand %p739_p8, %p976_p3 }
  0x10   : > { %s242_s9 = sshll.u32 %s232_s8, 4  ;;  %s1008_s11 = scalar_lea.sflag [#allocation4], %s228_s28  ;;  %s1006_s9 = int_to_ptr.vmem [resolvable:$true] %s242_s9 }
  0x11   : > { %s796_s12 = scalar_lea.hbm %s998_s7, 512  ;;  %p798_p11 = pneg %p1002_p9 }
  0x12   : > { %p797_p10 = scmp.ne.s32.totalorder %s998_s7, %s796_s12  ;;  %s801_s15 = scalar_lea.hbm %s1124_s1, 2048 }
  0x13   : > { %p802_p0 = scmp.lt.u32.totalorder %s998_s7, %s1124_s1  ;;  %p803_p1 = scmp.lt.u32.totalorder %s801_s15, %s796_s12 }
  0x14   : > { %p799_p12 = pnand %p798_p11, %p797_p10  ;;  %p805_p3 = scmp.lt.u32.totalorder %s796_s12, %s998_s7 }
  0x15   : > { %p804_p2 = por %p803_p1, %p802_p0 }
  0x16   : > { %p800_p13 = pneg %p799_p12 }
  0x17   : > { %p806_p4 = por %p805_p3, %p804_p2 }
  0x19   : > { %p807_p5 = pnand %p806_p4, %p800_p13 }
  0x1b   : > { %810 = shalt.err (!%p807_p5)
}
  0x1c   : > { %s811_s25 = scalar_lea.vmem %s1006_s9, 512  ;;  %s908_s28 = smov [#allocation3]  }
  0x1d   : > { %p812_p6 = scmp.ne.s32.totalorder %s1006_s9, %s811_s25  ;;  %s816_s29 = sshll.u32 %s908_s28, 4  ;;  %s817_s29 = int_to_ptr.vmem [resolvable:$false] %s816_s29 }
  0x1e   : > { %s818_s30 = scalar_lea.vmem %s817_s29, 1024  ;;  %p819_p12 = scmp.lt.s32.totalorder %s1006_s9, %s817_s29 }
  0x1f   : > { %p814_p8 = pnand %p812_p6, %p798_p11  ;;  %p820_p0 = scmp.lt.s32.totalorder %s818_s30, %s811_s25 }
  0x21   : > { %p815_p10 = pneg %p814_p8  ;;  %p821_p1 = por %p820_p0, %p819_p12 }
  0x23   : > { %p822_p2 = pnand %p821_p1, %p815_p10 }
  0x25   : > { %825 = shalt.err (!%p822_p2)
}
  0x26   : > { %s909_s5 = smov 128   ;;  %s910_s6 = smov 8  }
  0x27   : > { %738 = dma.hbm_to_vmem [thread:$0]  (!%p1002_p9), %s998_s7, 512, %s1006_s9, %s1008_s11, %s909_s5, %s909_s5, %s910_s6  }
  0x28   : > { %p680_p11 = scmp.ge.s32.totalorder %s906_s20, 1  ;;  %p250_p13 = scmp.lt.s32.totalorder %s906_s20, 5 }
  0x2a   : > { %p251_p3 = pnand %p680_p11, %p250_p13 }
  0x2b   : > { %s256_s8 = sand.u32 (!%p251_p3), 1, %s890_s16  }
  0x2c   : > { %254 = sbr.rel (%p251_p3) target bundleno = 526 (0x20e), region = 36  ;;  %s681_s12 = sshll.u32 (!%p251_p3), %s256_s8, 5 }
  0x2d   : > { %s257_s13 = scalar_lea.sflag (!%p251_p3), [#allocation4], %s256_s8  ;;  %s260_s14 = scalar_lea.vmem (!%p251_p3), [#allocation3], %s681_s12 }
  0x33   : > { %877 = dma.done.wait (%p985_p7), %s257_s13, 512  }
  0x34   : > { %879 = vsyncadd (%p985_p7), %s257_s13, 4294966784  ;;  %p319_p4 = scmp.eq.s32.totalorder %s898_s18, 0 }
  0x35   : > { %vm324_vm0 = vcmask (%p319_p4), 261120   ;;  %v911_v0 = vmov (%p319_p4), 0.0  }
  0x36   : > { %323 = sbr.rel (!%p319_p4) target bundleno = 61 (0x3d), region = 44  ;;  %325 = vst.msk [vmem:[#allocation2] sm:$0xff] (%p319_p4), %vm324_vm0, %v911_v0  ;;  %326 = vst.msk [vmem:[#allocation2 + $0x8] sm:$0xff] (%p319_p4), %vm324_vm0, %v911_v0 }
  0x3d PF: > { %v344_v1 = vld [vmem:[%s260_s14] sm:$0xff]  ;;  %v345_v2 = vld [vmem:[%s260_s14 + $0x8] sm:$0xff]  ;;  %v346_v3 = vld [vmem:[%s260_s14 + $0x10] sm:$0xff]  ;;  %vm348_vm1 = vcmask 261120   ;;  %v327_v4 = vlaneseq  ;;  %v329_v8 = vstv %s898_s18  ;;  %vm335_vm2 = vcmask 31744   ;;  %p438_p7 = scmp.eq.s32.totalorder %s898_s18, 3 }
  0x3e   : > { %v721_v5 = vpack.c.bf16 %v345_v2, %v344_v1  ;;  %v347_v6 = vld [vmem:[%s260_s14 + $0x18] sm:$0xff]  ;;  %v342_v7 = vld [vmem:[%s1123_s0] sm:$0xff]  ;;  %vm452_vm4 = vcmask (%p438_p7), 1043456  }
  0x3f   : > { %v725_v9 = vpack.c.bf16 %v347_v6, %v346_v3  ;;  %713 = vmatprep.mubr.msk.f32.mxu0 %vm348_vm1, %v342_v7  ;;  %v328_v10 = vand.u32 127, %v327_v4  ;;  %v331_v11 = vld [vmem:[%s1125_s2] sm:$0xff]  ;;  %v332_v12 = vld [vmem:[%s1125_s2 + $0x8] sm:$0xff] }
  0x40   : > { %722 = vmatprep.subr.bf16.mxu0 %v721_v5  ;;  %v343_v16 = vld [vmem:[%s1123_s0 + $0x8] sm:$0xff]  ;;  %v430_v24 = vld [vmem:[#allocation2] sm:$0xff] }
  0x41   : > { %724 = vmatpush3.bf16.msra.mxu0 %v721_v5  ;;  %vm330_vm3 = vcmp.eq.s32.totalorder %v328_v10, %v329_v8  ;;  %v431_v21 = vld [vmem:[#allocation2 + $0x8] sm:$0xff]  ;;  %v445_v28 = vld [vmem:[%s1126_s3] sm:$0xf] (%p438_p7) }
  0x42   : > { %726 = vmatprep.subr.bf16.mxu0 %v725_v9  ;;  %v333_v13 = vsel %vm330_vm3, %v331_v11, 0.0  ;;  %v334_v14 = vsel %vm330_vm3, %v332_v12, 0.0  ;;  %v443_v29 = vld [vmem:[%s1125_s2] sm:$0xff] (%p438_p7)  ;;  %v444_v30 = vld [vmem:[%s1125_s2 + $0x8] sm:$0xff] (%p438_p7) }
  0x43   : > { %v336_v15 = vsel %vm335_vm2, %v333_v13, 0.0  ;;  %v339_v17 = vsel %vm335_vm2, %v334_v14, 0.0 }
  0x44   : > { %337 = vadd.xlane.f32.xlu0 %v336_v15 }
  0x45   : > { %728 = vmatpush3.bf16.msra.mxu0 %v725_v9 }
  0x46   : > { %716 = vmatprep.subr.msk.mxu0 (%p438_p7), %vm452_vm4, %v445_v28 }
  0x48   : > { %714 = vmatmul.mubr.msk.f32.vlgmr.msra.gmra.mrb[0].mxu0 %vm348_vm1, %v343_v16  ;;  %340 = vadd.xlane.f32.xlu0 %v339_v17 }
  0x49   : > { %718 = vmatprep.mubr.msk.f32.mxu0 (%p438_p7), %vm335_vm2, %v443_v29  ;;  %717 = vmatpush3.msk.msra.mxu0 (%p438_p7), %vm452_vm4, %v445_v28 }
  0xd1   : > { %v338_v18 = vpop.xlane.xlu0 %337 }
  0xd5   : > { %v341_v19 = vpop.xlane.xlu0 %340 }
 0x11b   : > { %v715_v20 = vpop.f32.mrb[0].mxu0  ;;  %442 = sbr.rel (!%p438_p7) target bundleno = 500 (0x1f4), region = 48 }
 0x11c   : > { %v433_v22 = vmul.f32 %v715_v20, %v341_v19  ;;  %v421_v23 = vpop.f32.mrb[1].mxu0  ;;  %719 = vmatmul.mubr.msk.f32.vlgmr.msra.gmra.mrb[0].mxu0 (%p438_p7), %vm335_vm2, %v444_v30 }
 0x11d   : > { %v432_v25 = vmul.f32 %v421_v23, %v338_v18 }
 0x11e   : > { %v435_v26 = vadd.f32 %v433_v22, %v431_v21 }
 0x11f   : > { %v434_v27 = vadd.f32 %v432_v25, %v430_v24 }
 0x120   : > { %437 = vst.msk [vmem:[#allocation2 + $0x8] sm:$0xff] %vm348_vm1, %v435_v26 }
 0x121   : > { %436 = vst.msk [vmem:[#allocation2] sm:$0xff] %vm348_vm1, %v434_v27 }
 0x127   : > { %v532_v31 = vld [vmem:[#allocation2 + $0x8] sm:$0xff] }
 0x128   : > { %v531_v32 = vld [vmem:[#allocation2] sm:$0xff] }
 0x1ef   : > { %v720_v33 = vpop.f32.mrb[0].mxu0 }
 0x1f0   : > { %v534_v34 = vadd.f32 %v720_v33, %v532_v31  ;;  %v522_v35 = vpop.f32.mrb[1].mxu0 }
 0x1f1   : > { %v533_v36 = vadd.f32 %v531_v32, %v522_v35 }
 0x1f2   : > { %536 = vst.msk [vmem:[#allocation6 + $0x8] sm:$0xff] %vm348_vm1, %v534_v34 }
 0x1f3   : > { %535 = vst.msk [vmem:[#allocation6] sm:$0xff] %vm348_vm1, %v533_v36 }
 0x1f4 PF: > { %p1079_p9 = scmp.eq.s32.totalorder %s671_s21, 3  ;;  %s912_s8 = smov [#allocation6]  }
 0x1f5   : > { %s547_s12 = sshll.u32 %s912_s8, 4  ;;  %s548_s12 = int_to_ptr.vmem [resolvable:$true] %s547_s12 }
 0x1f6   : > { %s826_s13 = scalar_lea.vmem %s548_s12, 256  ;;  %p833_p10 = scmp.lt.s32.totalorder %s548_s12, %s548_s12 }
 0x1f7   : > { %p827_p5 = scmp.ne.s32.totalorder %s548_s12, %s826_s13  ;;  %p834_p12 = scmp.lt.s32.totalorder %s826_s13, %s826_s13 }
 0x1f9   : > { %p828_p6 = pnand %p827_p5, %p1079_p9  ;;  %p835_p0 = por %p834_p12, %p833_p10 }
 0x1fb   : > { %p829_p8 = pneg %p828_p6 }
 0x1fd   : > { %p836_p1 = pnand %p835_p0, %p829_p8 }
 0x1ff   : > { %839 = shalt.err (!%p836_p1)
}
 0x200   : > { %s840_s21 = scalar_lea.hbm %s1127_s4, 256 }
 0x201   : > { %p841_p2 = scmp.ne.s32.totalorder %s1127_s4, %s840_s21  ;;  %p846_p3 = scmp.lt.u32.totalorder %s840_s21, %s1127_s4 }
 0x203   : > { %p842_p11 = pnand %p841_p2, %p1079_p9 }
 0x205   : > { %p843_p13 = pneg %p842_p11 }
 0x207   : > { %p848_p4 = pnand %p846_p3, %p843_p13 }
 0x209   : > { %851 = shalt.err (!%p848_p4)
}
 0x20a   : > { %s913_s15 = smov 128   ;;  %s914_s23 = smov 8  }
 0x20b   : > { %732 = dma.vmem_to_hbm [thread:$0]  (%p1079_p9), %s548_s12, 256, %s1127_s4, [#allocation5], %s913_s15, %s913_s15, %s914_s23  }
 0x20c   : > { %881 = dma.done.wait (%p1079_p9), [#allocation5], 256  }
 0x20d   : > { %883 = vsyncadd (%p1079_p9), [#allocation5], 4294967040 }
 0x20e PF: > { %s18_s20 = sadd.s32 1, %s906_s20   ;;  %s1132_s15 = smov %s890_s16 }
 0x20f   : > { %p15_p7 = scmp.ge.s32.totalorder %s18_s20, 6   ;;  %s1133_s16 = smov %s894_s17 }
 0x210   : > { %s1134_s17 = smov %s991_s27  ;;  %s1135_s18 = smov %s902_s19 }
 0x211   : > { %s1136_s19 = smov %s1138_s22  ;;  %17 = sbr.rel (!%p15_p7) target bundleno = 5 (0x5), region = 91 }
 0x218   :  { %563 = vsyncpa [#allocation4], 1 }
 0x219   :  { %565 = vsyncpa [#allocation4 + $0x1], 1 }
 0x21a   :  { %566 = vsyncpa [#allocation5], 1 }
 0x21b   :  { %568 = vsyncpa [#allocation5 + $0x1], 1 }

</bundles_post_ra>
